<compile_context>
chip_gen: v7x
topology: tpu7x:2x2x1
jax: 0.10.0
libtpu: 0.0.40
codegen_flags: <defaults>
</compile_context>

<pallas_src>
import functools

import jax
import jax.numpy as jnp
from jax import lax
from jax.experimental import pallas as pl
from jax.experimental.pallas import tpu as pltpu


def _round_up(x: int, m: int) -> int:
    return ((x + m - 1) // m) * m


def _chord_tone_loss_kernel(mask_ref, wgt_ref, logits_ref, targets_ref,
                            loss_ref, acc_ref, *,
                            batch_size, tile_b, tiles_per_core):
    """One (TB, C) batch tile.  Grid = (core, tile); tile axis is the reduction."""
    c = pl.program_id(0)          # core-split axis ("parallel")
    i = pl.program_id(1)          # batch-tile axis ("arbitrary" reduction)
    n = pl.num_programs(1)

    @pl.when(i == 0)
    def _init():
        acc_ref[...] = jnp.zeros_like(acc_ref)

    # (TB, C) blocks straight from HBM (row-major, no wrapper transpose); flip to
    # the lane-dense (C, TB) layout on the XLU so the class-axis math runs on full
    # vregs (batch on the 128-wide lane axis, tiny class axis on sublanes).
    x = jnp.transpose(logits_ref[...].astype(jnp.float32))    # (C, TB)
    t = jnp.transpose(targets_ref[...].astype(jnp.float32))   # (C, TB)

    mf = mask_ref[...]            # (C, 1) f32: 1.0 for chord-type rows, 0.0 for chord-tone rows
    wf = wgt_ref[...]             # (C, 1) f32: coef for type rows, 1-coef for tone rows
    nf = jnp.float32(1.0) - mf
    neg = jnp.float32(-1e30)      # finite "minus infinity" (avoids 0*inf NaNs)

    # Per-slice max via the resident 0/1 mask column (no per-step iota over classes).
    type_max = jnp.max(x * mf + nf * neg, axis=0, keepdims=True)   # (1, TB)
    tone_max = jnp.max(x * nf + mf * neg, axis=0, keepdims=True)   # (1, TB)
    z = x - (mf * type_max + nf * tone_max)                        # z <= 0 inside each row's own slice
    e = jnp.exp(z)                                                 # single EUP pass over the tile
    e_type = e * mf
    e_tone = e - e_type
    lse = (mf * jnp.log(jnp.sum(e_type, axis=0, keepdims=True))
           + nf * jnp.log(jnp.sum(e_tone, axis=0, keepdims=True)))  # per-slice log-sum-exp, (C, TB)
    logp = z - lse                                                  # per-slice log_softmax
    contrib = wf * t * logp                                         # weighted soft-target CE terms
    partial = jnp.sum(contrib, axis=0, keepdims=True)               # (1, TB) class-axis reduce

    # Mask padded / duplicated batch columns ONCE, after the class-axis reductions.
    # Use the un-clamped tile index so fully-duplicated tiles contribute exactly 0.
    tile_idx = c * tiles_per_core + i
    col = lax.broadcasted_iota(jnp.int32, partial.shape, 1)         # (1, TB)
    valid = (col + tile_idx * tile_b) < batch_size
    acc_ref[...] += jnp.where(valid, partial, jnp.float32(0.0))

    @pl.when(i == n - 1)
    def _finalize():
        total = jnp.sum(acc_ref[...]) * jnp.float32(-1.0 / batch_size)
        loss_ref[...] = jnp.reshape(total, (1, 1, 1))


def chord_tone_loss(output, target, *, num_chord_types, chord_type_coef=0.5,
                    max_tile_b=4096):
    """Weighted soft-target CE over the [:K] and [K:] class slices (mean over batch)."""
    B, C = output.shape
    assert C == num_chord_types + 12
    assert target.shape == output.shape
    assert max_tile_b % 8 == 0
    K = num_chord_types

    # Batch tile: multiple of 8 (sublane rule on the (TB, C) block); capped at 4096
    # so lane-padded f32 VMEM buffers (TB x 128 x 4 B each) stay small on v7x.
    TB = min(_round_up(B, 8), max_tile_b)
    tiles_total = pl.cdiv(B, TB)
    tiles_per_core = pl.cdiv(tiles_total, 2)   # leading size-2 "parallel" axis -> both TCs on v7x
    last_tile = tiles_total - 1

    # Tiny resident per-class constants: 0/1 chord-type mask and per-class loss weight.
    cls = jnp.arange(C, dtype=jnp.int32)
    mask_col = (cls < K).astype(jnp.float32).reshape(C, 1)
    wgt_col = jnp.where(cls < K,
                        jnp.float32(chord_type_coef),
                        jnp.float32(1.0 - chord_type_coef)).reshape(C, 1)

    def tile_map(c, i):
        # Clamp so the (possibly) duplicated last tile of the odd split never DMAs
        # out of bounds; its columns are fully masked inside the kernel anyway.
        return (jnp.minimum(c * tiles_per_core + i, last_tile), 0)

    kernel = functools.partial(
        _chord_tone_loss_kernel,
        batch_size=B, tile_b=TB, tiles_per_core=tiles_per_core)

    partials = pl.pallas_call(
        kernel,
        out_shape=jax.ShapeDtypeStruct((2, 1, 1), jnp.float32),
        grid_spec=pltpu.PrefetchScalarGridSpec(
            num_scalar_prefetch=0,
            grid=(2, tiles_per_core),
            in_specs=[
                pl.BlockSpec((C, 1), lambda c, i: (0, 0)),   # chord-type mask (resident)
                pl.BlockSpec((C, 1), lambda c, i: (0, 0)),   # per-class weight (resident)
                pl.BlockSpec((TB, C), tile_map),             # logits, contiguous rows
                pl.BlockSpec((TB, C), tile_map),             # targets, contiguous rows
            ],
            out_specs=pl.BlockSpec((1, 1, 1), lambda c, i: (c, 0, 0)),
            scratch_shapes=[pltpu.VMEM((1, TB), jnp.float32)],   # per-lane accumulator
        ),
        compiler_params=pltpu.CompilerParams(
            dimension_semantics=("parallel", "arbitrary"),
            vmem_limit_bytes=48 * 1024 * 1024,   # ~3x headroom over ~15 MiB worst case; < v7x 64 MiB
        ),
    )(mask_col, wgt_col, output, target)

    return jnp.sum(partials)   # per-core partials already carry the 1/B scale and sign


def _reference(output, target, num_chord_types, chord_type_coef=0.5):
    """Pure-JAX reference matching torch.nn.CrossEntropyLoss with soft targets."""
    K = num_chord_types

    def soft_ce(logits, targets):
        logp = jax.nn.log_softmax(logits.astype(jnp.float32), axis=-1)
        return jnp.mean(-jnp.sum(targets.astype(jnp.float32) * logp, axis=-1))

    tl = soft_ce(output[:, :K], target[:, :K])
    nl = soft_ce(output[:, K:], target[:, K:])
    return chord_type_coef * tl + (1.0 - chord_type_coef) * nl


def _make_inputs(key, B, num_chord_types):
    C = num_chord_types + 12
    k1, k2, k3 = jax.random.split(key, 3)
    output = jax.random.normal(k1, (B, C), dtype=jnp.float32)
    tgt_type = jax.nn.softmax(jax.random.normal(k2, (B, num_chord_types)), axis=-1)
    tgt_tone = jax.nn.softmax(jax.random.normal(k3, (B, 12)), axis=-1)
    target = jnp.concatenate([tgt_type, tgt_tone], axis=1).astype(jnp.float32)
    return output, target


if __name__ == "__main__":
    num_chord_types = 4
    key = jax.random.PRNGKey(0)
    k_small, k_big = jax.random.split(key)

    # Small case (matches the module's toy usage): single batch tile.
    B = 8
    output, target = _make_inputs(k_small, B, num_chord_types)
    loss = chord_tone_loss(output, target,
                           num_chord_types=num_chord_types, chord_type_coef=0.5)
    loss = jax.block_until_ready(loss)
    ref = _reference(output, target, num_chord_types, 0.5)
    assert jnp.allclose(loss, ref, rtol=1e-4, atol=1e-5), (loss, ref)

    # Non-128-aligned batch with a small tile cap: exercises multi-tile accumulation,
    # the partial last tile, the odd per-core split (duplicated clamped tile), and
    # the two-core partial-sum output path.
    B2 = 272
    output2, target2 = _make_inputs(k_big, B2, num_chord_types)
    loss2 = chord_tone_loss(output2, target2,
                            num_chord_types=num_chord_types, chord_type_coef=0.3,
                            max_tile_b=128)
    loss2 = jax.block_until_ready(loss2)
    ref2 = _reference(output2, target2, num_chord_types, 0.3)
    assert jnp.allclose(loss2, ref2, rtol=1e-4, atol=1e-5), (loss2, ref2)

    print("KERNEL_OK")
</pallas_src>

<mosaic_0001>
module attributes {stable_mosaic.version = 11 : i64} {
  func.func @_chord_tone_loss_kernel(%arg0: i32, %arg1: i32, %arg2: memref<16x1xf32, #tpu.memory_space<vmem>>, %arg3: memref<16x1xf32, #tpu.memory_space<vmem>>, %arg4: memref<8x16xf32, #tpu.memory_space<vmem>>, %arg5: memref<8x16xf32, #tpu.memory_space<vmem>>, %arg6: memref<1x1x1xf32, #tpu.memory_space<vmem>>, %arg7: memref<1x8xf32, #tpu.memory_space<vmem>>) attributes {dimension_semantics = [#tpu.dimension_semantics<parallel>, #tpu.dimension_semantics<arbitrary>], iteration_bounds = array<i64: 2, 1>, scalar_prefetch = 0 : i64, scratch_operands = 1 : i64, tpu.core_type = #tpu.core_type<tc>, window_params = [{pipeline_mode = #tpu.pipeline_mode<synchronous>, transform_indices = @transform_0, window_bounds = array<i64: 16, 1>}, {pipeline_mode = #tpu.pipeline_mode<synchronous>, transform_indices = @transform_1, window_bounds = array<i64: 16, 1>}, {transform_indices = @transform_2, window_bounds = array<i64: 8, 16>}, {transform_indices = @transform_3, window_bounds = array<i64: 8, 16>}, {transform_indices = @transform_4, window_bounds = array<i64: 1, 1, 1>}]} {
    %c0_i32 = arith.constant 0 : i32
    %0 = arith.cmpi eq, %arg1, %c0_i32 : i32
    %1 = arith.extui %0 : i1 to i32
    %c0_i32_0 = arith.constant 0 : i32
    %2 = arith.cmpi ne, %1, %c0_i32_0 : i32
    scf.if %2 {
      %cst_23 = arith.constant 0.000000e+00 : f32
      %74 = vector.broadcast %cst_23 : f32 to vector<1x8xf32>
      %c0_24 = arith.constant 0 : index
      %c0_25 = arith.constant 0 : index
      %75 = vector.load %arg7[%c0_24, %c0_25] : memref<1x8xf32, #tpu.memory_space<vmem>>, vector<1x8xf32>
      tpu.vector_store %arg7[%c0_24, %c0_25], %74 {strides = array<i32>} : memref<1x8xf32, #tpu.memory_space<vmem>>, vector<1x8xf32>,
    } else {
    }
    %c0 = arith.constant 0 : index
    %c0_1 = arith.constant 0 : index
    %3 = vector.load %arg4[%c0, %c0_1] : memref<8x16xf32, #tpu.memory_space<vmem>>, vector<8x16xf32>
    %4 = tpu.transpose %3, [1, 0] : vector<8x16xf32> -> vector<16x8xf32>
    %c0_2 = arith.constant 0 : index
    %c0_3 = arith.constant 0 : index
    %5 = vector.load %arg5[%c0_2, %c0_3] : memref<8x16xf32, #tpu.memory_space<vmem>>, vector<8x16xf32>
    %6 = tpu.transpose %5, [1, 0] : vector<8x16xf32> -> vector<16x8xf32>
    %c0_4 = arith.constant 0 : index
    %c0_5 = arith.constant 0 : index
    %7 = vector.load %arg2[%c0_4, %c0_5] : memref<16x1xf32, #tpu.memory_space<vmem>>, vector<16x1xf32>
    %c0_6 = arith.constant 0 : index
    %c0_7 = arith.constant 0 : index
    %8 = vector.load %arg3[%c0_6, %c0_7] : memref<16x1xf32, #tpu.memory_space<vmem>>, vector<16x1xf32>
    %cst = arith.constant 1.000000e+00 : f32
    %9 = vector.broadcast %cst : f32 to vector<16x1xf32>
    %10 = arith.subf %9, %7 : vector<16x1xf32>
    %11 = vector.broadcast %7 : vector<16x1xf32> to vector<16x8xf32>
    %12 = arith.mulf %4, %11 : vector<16x8xf32>
    %cst_8 = arith.constant -1.000000e+30 : f32
    %13 = vector.broadcast %cst_8 : f32 to vector<16x1xf32>
    %14 = arith.mulf %10, %13 : vector<16x1xf32>
    %15 = vector.broadcast %14 : vector<16x1xf32> to vector<16x8xf32>
    %16 = arith.addf %12, %15 : vector<16x8xf32>
    %cst_9 = arith.constant dense<0xFF800000> : vector<8xf32>
    %17 = vector.multi_reduction <maximumf>, %16, %cst_9 [0] : vector<16x8xf32> to vector<8xf32>
    %18 = vector.shape_cast %17 : vector<8xf32> to vector<1x8xf32>
    %19 = vector.broadcast %10 : vector<16x1xf32> to vector<16x8xf32>
    %20 = arith.mulf %4, %19 : vector<16x8xf32>
    %cst_10 = arith.constant -1.000000e+30 : f32
    %21 = vector.broadcast %cst_10 : f32 to vector<16x1xf32>
    %22 = arith.mulf %7, %21 : vector<16x1xf32>
    %23 = vector.broadcast %22 : vector<16x1xf32> to vector<16x8xf32>
    %24 = arith.addf %20, %23 : vector<16x8xf32>
    %cst_11 = arith.constant dense<0xFF800000> : vector<8xf32>
    %25 = vector.multi_reduction <maximumf>, %24, %cst_11 [0] : vector<16x8xf32> to vector<8xf32>
    %26 = vector.shape_cast %25 : vector<8xf32> to vector<1x8xf32>
    %27 = vector.broadcast %7 : vector<16x1xf32> to vector<16x8xf32>
    %28 = vector.broadcast %18 : vector<1x8xf32> to vector<16x8xf32>
    %29 = arith.mulf %27, %28 : vector<16x8xf32>
    %30 = vector.broadcast %10 : vector<16x1xf32> to vector<16x8xf32>
    %31 = vector.broadcast %26 : vector<1x8xf32> to vector<16x8xf32>
    %32 = arith.mulf %30, %31 : vector<16x8xf32>
    %33 = arith.addf %29, %32 : vector<16x8xf32>
    %34 = arith.subf %4, %33 : vector<16x8xf32>
    %35 = math.exp %34 : vector<16x8xf32>
    %36 = vector.broadcast %7 : vector<16x1xf32> to vector<16x8xf32>
    %37 = arith.mulf %35, %36 : vector<16x8xf32>
    %38 = arith.subf %35, %37 : vector<16x8xf32>
    %cst_12 = arith.constant dense<0.000000e+00> : vector<8xf32>
    %39 = vector.multi_reduction <add>, %37, %cst_12 [0] : vector<16x8xf32> to vector<8xf32>
    %40 = vector.shape_cast %39 : vector<8xf32> to vector<1x8xf32>
    %41 = math.log %40 : vector<1x8xf32>
    %42 = vector.broadcast %7 : vector<16x1xf32> to vector<16x8xf32>
    %43 = vector.broadcast %41 : vector<1x8xf32> to vector<16x8xf32>
    %44 = arith.mulf %42, %43 : vector<16x8xf32>
    %cst_13 = arith.constant dense<0.000000e+00> : vector<8xf32>
    %45 = vector.multi_reduction <add>, %38, %cst_13 [0] : vector<16x8xf32> to vector<8xf32>
    %46 = vector.shape_cast %45 : vector<8xf32> to vector<1x8xf32>
    %47 = math.log %46 : vector<1x8xf32>
    %48 = vector.broadcast %10 : vector<16x1xf32> to vector<16x8xf32>
    %49 = vector.broadcast %47 : vector<1x8xf32> to vector<16x8xf32>
    %50 = arith.mulf %48, %49 : vector<16x8xf32>
    %51 = arith.addf %44, %50 : vector<16x8xf32>
    %52 = arith.subf %34, %51 : vector<16x8xf32>
    %53 = vector.broadcast %8 : vector<16x1xf32> to vector<16x8xf32>
    %54 = arith.mulf %53, %6 : vector<16x8xf32>
    %55 = arith.mulf %54, %52 : vector<16x8xf32>
    %cst_14 = arith.constant dense<0.000000e+00> : vector<8xf32>
    %56 = vector.multi_reduction <add>, %55, %cst_14 [0] : vector<16x8xf32> to vector<8xf32>
    %57 = vector.shape_cast %56 : vector<8xf32> to vector<1x8xf32>
    %c1_i32 = arith.constant 1 : i32
    %58 = arith.muli %arg0, %c1_i32 : i32
    %59 = arith.addi %58, %arg1 : i32
    %60 = tpu.iota {dimensions = array<i32: 1>} : vector<1x8xi32>
    %c8_i32 = arith.constant 8 : i32
    %61 = arith.muli %59, %c8_i32 : i32
    %62 = vector.broadcast %61 : i32 to vector<1x8xi32>
    %63 = arith.addi %60, %62 : vector<1x8xi32>
    %c8_i32_15 = arith.constant 8 : i32
    %64 = vector.broadcast %c8_i32_15 : i32 to vector<1x8xi32>
    %65 = arith.cmpi slt, %63, %64 : vector<1x8xi32>
    %c0_16 = arith.constant 0 : index
    %c0_17 = arith.constant 0 : index
    %66 = vector.load %arg7[%c0_16, %c0_17] : memref<1x8xf32, #tpu.memory_space<vmem>>, vector<1x8xf32>
    %cst_18 = arith.constant 0.000000e+00 : f32
    %67 = vector.broadcast %cst_18 : f32 to vector<1x8xf32>
    %68 = arith.select %65, %57, %67 : vector<1x8xi1>, vector<1x8xf32>
    %69 = arith.addf %66, %68 : vector<1x8xf32>
    %c0_19 = arith.constant 0 : index
    %c0_20 = arith.constant 0 : index
    %70 = vector.load %arg7[%c0_19, %c0_20] : memref<1x8xf32, #tpu.memory_space<vmem>>, vector<1x8xf32>
    tpu.vector_store %arg7[%c0_19, %c0_20], %69 {strides = array<i32>} : memref<1x8xf32, #tpu.memory_space<vmem>>, vector<1x8xf32>,
    %c0_i32_21 = arith.constant 0 : i32
    %71 = arith.cmpi eq, %arg1, %c0_i32_21 : i32
    %72 = arith.extui %71 : i1 to i32
    %c0_i32_22 = arith.constant 0 : i32
    %73 = arith.cmpi ne, %72, %c0_i32_22 : i32
    scf.if %73 {
      %c0_23 = arith.constant 0 : index
      %c0_24 = arith.constant 0 : index
      %74 = vector.load %arg7[%c0_23, %c0_24] : memref<1x8xf32, #tpu.memory_space<vmem>>, vector<1x8xf32>
      %75 = vector.shape_cast %74 : vector<1x8xf32> to vector<1x1x8xf32>
      %cst_25 = arith.constant dense<0.000000e+00> : vector<1xf32>
      %76 = vector.multi_reduction <add>, %75, %cst_25 [1, 2] : vector<1x1x8xf32> to vector<1xf32>
      %77 = vector.shape_cast %76 : vector<1xf32> to vector<1x1x1xf32>
      %78 = vector.extract %77[0, 0, 0] : f32 from vector<1x1x1xf32>
      %cst_26 = arith.constant -1.250000e-01 : f32
      %79 = arith.mulf %78, %cst_26 : f32
      %80 = vector.broadcast %79 : f32 to vector<1x1x1xf32>
      %c0_27 = arith.constant 0 : index
      %c0_28 = arith.constant 0 : index
      %c0_29 = arith.constant 0 : index
      %81 = vector.load %arg6[%c0_27, %c0_28, %c0_29] : memref<1x1x1xf32, #tpu.memory_space<vmem>>, vector<1x1x1xf32>
      tpu.vector_store %arg6[%c0_27, %c0_28, %c0_29], %80 {strides = array<i32>} : memref<1x1x1xf32, #tpu.memory_space<vmem>>, vector<1x1x1xf32>,
    } else {
    }
    return
  }
  func.func @transform_0(%arg0: i32, %arg1: i32) -> (i32, i32) {
    %c0_i32 = arith.constant 0 : i32
    %c0_i32_0 = arith.constant 0 : i32
    %c0_i32_1 = arith.constant 0 : i32
    return %c0_i32, %c0_i32_0 : i32, i32
  }
  func.func @transform_1(%arg0: i32, %arg1: i32) -> (i32, i32) {
    %c0_i32 = arith.constant 0 : i32
    %c0_i32_0 = arith.constant 0 : i32
    %c0_i32_1 = arith.constant 0 : i32
    return %c0_i32, %c0_i32_0 : i32, i32
  }
  func.func @transform_2(%arg0: i32, %arg1: i32) -> (i32, i32) {
    %c1_i32 = arith.constant 1 : i32
    %0 = arith.muli %arg0, %c1_i32 : i32
    %1 = arith.addi %0, %arg1 : i32
    %c0_i32 = arith.constant 0 : i32
    %2 = arith.minsi %1, %c0_i32 : i32
    %c0_i32_0 = arith.constant 0 : i32
    %c0_i32_1 = arith.constant 0 : i32
    return %2, %c0_i32_0 : i32, i32
  }
  func.func @transform_3(%arg0: i32, %arg1: i32) -> (i32, i32) {
    %c1_i32 = arith.constant 1 : i32
    %0 = arith.muli %arg0, %c1_i32 : i32
    %1 = arith.addi %0, %arg1 : i32
    %c0_i32 = arith.constant 0 : i32
    %2 = arith.minsi %1, %c0_i32 : i32
    %c0_i32_0 = arith.constant 0 : i32
    %c0_i32_1 = arith.constant 0 : i32
    return %2, %c0_i32_0 : i32, i32
  }
  func.func @transform_4(%arg0: i32, %arg1: i32) -> (i32, i32, i32) {
    %c0_i32 = arith.constant 0 : i32
    %c0_i32_0 = arith.constant 0 : i32
    %c0_i32_1 = arith.constant 0 : i32
    return %arg0, %c0_i32, %c0_i32_0 : i32, i32, i32
  }
}

</mosaic_0001>

<bundles_post_ra>
// kernel: tpu_custom_call.1
= control target key start
LH: loop header
LB: loop body
LE: loop exit
PB: predicated region body
PF: predicated region fallthrough
CT: control target
= control target key end

     0   :  { %s682_s15 = smov 0   ;;  %s684_s16 = smov 0   ;;  %s772_s0 = inlined_call_operand.vmem [shape: f32[16,1], index: 0, kind: input, shape index: {}]   ;;  %s773_s1 = inlined_call_operand.vmem [shape: f32[16,1], index: 1, kind: input, shape index: {}]   ;;  %s774_s2 = inlined_call_operand.vmem [shape: f32[8,16], index: 2, kind: input, shape index: {}]   ;;  %s775_s3 = inlined_call_operand.vmem [shape: f32[8,16], index: 3, kind: input, shape index: {}]   ;;  %s776_s4 = inlined_call_operand.vmem [shape: f32[2,1,1], index: 4, kind: output, shape index: {}]  }
   0x1   :  { %s686_s17 = smov 0  }
   0x2 LB: > { %s26_s18 = sadd.s32 1, %s649_s16  ;;  %p581_p0 = scmp.ge.s32.totalorder %s653_s17, 1  ;;  %s653_s17 = sphi %s686_s17, %s14_s17   ;;  %s649_s16 = sphi %s684_s16, %s778_s16   ;;  %s645_s15 = sphi %s682_s15, %s777_s15  }
   0x3   : > { %p28_p1 = scmp.ge.s32.totalorder %s26_s18, 2  ;;  %p206_p2 = scmp.lt.s32.totalorder %s653_s17, 3 }
   0x5   : > { %s780_s18 = smov (%p28_p1, %s26_s18), 0  ;;  %p207_p3 = pnand %p581_p0, %p206_p2 }
   0x6   : > { %v334_v0 = vld [vmem:[%s772_s0] sm:$0xff] (!%p207_p3)  ;;  %v335_v1 = vld [vmem:[%s772_s0 + $0x8] sm:$0xff] (!%p207_p3)  ;;  %v655_v2 = vmov (!%p207_p3), 0   ;;  %p240_p4 = scmp.lt.s32.totalorder (!%p207_p3), %s645_s15, 0  ;;  %vm266_vm0 = vcmask (!%p207_p3), 57344   ;;  %v656_v13 = vmov (!%p207_p3), 0.0  }
   0x7   : > { %210 = sbr.rel (%p207_p3) target bundleno = 497 (0x1f1), region = 36  ;;  %621 = vset.pattern.permute.xlu0 (!%p207_p3), %v655_v2  ;;  %622 = vset.pattern.permute.xlu1 (!%p207_p3), %v655_v2  ;;  %v338_v3 = vsub.f32 (!%p207_p3), 1.0, %v334_v0  ;;  %v339_v4 = vsub.f32 (!%p207_p3), 1.0, %v335_v1  ;;  %v388_v7 = vmul.f32 (!%p207_p3), -1e+30, %v334_v0  ;;  %v336_v9 = vld [vmem:[%s773_s1] sm:$0xff] (!%p207_p3) }
   0x8   : > { %342 = vperm.xlu0 (!%p207_p3), %621, %v334_v0   ;;  %v389_v8 = vmul.f32 (!%p207_p3), -1e+30, %v335_v1  ;;  %v337_v10 = vld [vmem:[%s773_s1 + $0x8] sm:$0xff] (!%p207_p3)  ;;  %267 = vst.msk [vmem:[#allocation2] sm:$0x1] (!%p207_p3), %vm266_vm0, %v656_v13  ;;  %vm366_vm1 = vcmask (!%p207_p3), 64512  }
   0x9   : > { %378 = vperm.xlu1 (!%p207_p3), %622, %v338_v3   ;;  %v352_v5 = vmul.f32 (!%p207_p3), -1e+30, %v338_v3  ;;  %v353_v6 = vmul.f32 (!%p207_p3), -1e+30, %v339_v4  ;;  %s590_s9 = sshll.u32 (!%p207_p3), %s645_s15, 3  ;;  %p259_p5 = scmp.lt.s32.totalorder (!%p207_p3), %s645_s15, 1 }
   0xa   : > { %vm508_vm3 = vcmask (!%p207_p3), 0  }
   0xc   : > { %347 = vperm.xlu0 (!%p207_p3), %621, %v335_v1  }
   0xd   : > { %383 = vperm.xlu1 (!%p207_p3), %622, %v339_v4  }
   0xe   : > { %s241_s27 = scalar_select %p240_p4, %s645_s15, 0 }
   0xf   : > { %s784_s15 = smov (!%p259_p5, %s645_s15), 1 }
  0x10   : > { %356 = vperm.xlu0 %621, %v352_v5   ;;  %s782_s27 = smov (!%p240_p4, %s241_s27), 0  ;;  %s261_s13 = scalar_lea.vmem %s776_s4, %s784_s15 }
  0x11   : > { %361 = vperm.xlu1 %622, %v353_v6   ;;  %s585_s28 = sshll.u32 %s782_s27, 3 }
  0x12   : > { %s245_s5 = scalar_lea.vmem %s774_s2, %s585_s28  ;;  %s255_s8 = scalar_lea.vmem %s775_s3, %s585_s28 }
  0x13   : > { %v268_v11 = vld [vmem:[%s245_s5] sm:$0xff] }
  0x14   : > { %392 = vperm.xlu0 %621, %v388_v7   ;;  %v301_v12 = vld [vmem:[%s255_s8] sm:$0xff] }
  0x15   : > { %397 = vperm.xlu1 %622, %v389_v8  }
  0x19   : > { %459 = vperm.xlu1 %622, %v336_v9  }
  0x1d   : > { %464 = vperm.xlu1 %622, %v337_v10  }
  0x32   : > { %269 = vxpose.xlu0.b32.start.end [1/1] (short) (narrow) %v268_v11, 16 }
  0x46   : > { %302 = vxpose.xlu1.b32.start.end [1/1] (short) (narrow) %v301_v12, 16 }
  0x87   : > { %v723_v14 = vpop.permute.xlu0 %342 }
  0x88   : > { %v727_v16 = vpop.permute.xlu1 %378 }
  0x8b   : > { %v725_v15 = vpop.permute.xlu0 %347 }
  0x8c   : > { %v729_v18 = vpop.permute.xlu1 %383 }
  0x8f   : > { %v357_v17 = vpop.permute.xlu0 %356 }
  0x90   : > { %v362_v20 = vpop.permute.xlu1 %361 }
  0x93   : > { %v393_v19 = vpop.permute.xlu0 %392 }
  0x94   : > { %v398_v29 = vpop.permute.xlu1 %397 }
  0xb2   : > { %v285_v21 = vpop.trf.xlu0 }
  0xb3   : > { %v350_v22 = vmul.f32 %v723_v14, %v285_v21  ;;  %v386_v23 = vmul.f32 %v727_v16, %v285_v21 }
  0xb5   : > { %v364_v25 = vadd.f32 %v357_v17, %v350_v22  ;;  %v400_v26 = vadd.f32 %v393_v19, %v386_v23  ;;  %v460_v23 = vpop.permute.xlu1 %459 }
  0xb6   : > { %v286_v24 = vpop.trf.xlu0 }
  0xb7   : > { %v351_v27 = vmul.f32 %v725_v15, %v286_v24  ;;  %v387_v28 = vmul.f32 %v729_v18, %v286_v24  ;;  %v367_v32 = vsel %vm366_vm1, %v364_v25, -inf  ;;  %v402_v33 = vsel %vm366_vm1, %v400_v26, -inf }
  0xb9   : > { %v365_v30 = vadd.f32 %v362_v20, %v351_v27  ;;  %v401_v31 = vadd.f32 %v398_v29, %v387_v28  ;;  %v465_v25 = vpop.permute.xlu1 %464 }
  0xbb   : > { %v368_v34 = vsel %vm366_vm1, %v365_v30, -inf  ;;  %v403_v35 = vsel %vm366_vm1, %v401_v31, -inf }
  0xbc   : > { %v369_v36 = vmax.f32 %v367_v32, %v368_v34  ;;  %v404_v37 = vmax.f32 %v402_v33, %v403_v35 }
  0xbe   : > { %v370_v38 = vrot.slane %v369_v36, 4  ;;  %v405_v39 = vrot.slane %v404_v37, 4 }
  0xc0   : > { %v371_v40 = vmax.f32 %v369_v36, %v370_v38  ;;  %v406_v41 = vmax.f32 %v404_v37, %v405_v39 }
  0xc2   : > { %v372_v42 = vrot.slane %v371_v40, 2  ;;  %v407_v43 = vrot.slane %v406_v41, 2 }
  0xc4   : > { %v373_v44 = vmax.f32 %v371_v40, %v372_v42  ;;  %v408_v45 = vmax.f32 %v406_v41, %v407_v43 }
  0xc6   : > { %v374_v46 = vrot.slane %v373_v44, 1  ;;  %v409_v47 = vrot.slane %v408_v45, 1  ;;  %v318_v27 = vpop.trf.xlu1 }
  0xc7   : > { %v467_v39 = vmul.f32 %v460_v23, %v318_v27 }
  0xc8   : > { %v375_v48 = vmax.f32 %v373_v44, %v374_v46  ;;  %v410_v49 = vmax.f32 %v408_v45, %v409_v47  ;;  %v481_v45 = vlaneseq }
  0xca   : > { %v412_v50 = vmul.f32 %v375_v48, %v725_v15  ;;  %v414_v51 = vmul.f32 %v410_v49, %v729_v18  ;;  %v411_v52 = vmul.f32 %v375_v48, %v723_v14  ;;  %v413_v53 = vmul.f32 %v410_v49, %v727_v16  ;;  %v319_v35 = vpop.trf.xlu1 }
  0xcb   : > { %v468_v41 = vmul.f32 %v465_v25, %v319_v35 }
  0xcc   : > { %v416_v54 = vadd.f32 %v414_v51, %v412_v50  ;;  %v415_v55 = vadd.f32 %v413_v53, %v411_v52  ;;  %v487_v53 = vld [vmem:[#allocation2] sm:$0x1] }
  0xce   : > { %v418_v56 = vsub.f32 %v286_v24, %v416_v54  ;;  %v417_v57 = vsub.f32 %v285_v21, %v415_v55 }
  0xd0   : > { %v421_v58 = vmul.f32 1.442695, %v418_v56  ;;  %v419_v59 = vmul.f32 1.442695, %v417_v57 }
  0xd2   : > { %623 = vpow2.f32 %v421_v58 }
  0xd3   : > { %625 = vpow2.f32 %v419_v59 }
  0xdc   : > { %v624_v60 = vpop.eup %623 }
  0xdd   : > { %v626_v61 = vpop.eup %625  ;;  %v424_v62 = vmul.f32 %v624_v60, %v725_v15 }
  0xde   : > { %v423_v63 = vmul.f32 %v626_v61, %v723_v14 }
  0xdf   : > { %v426_v0 = vsub.f32 %v624_v60, %v424_v62  ;;  %v428_v1 = vsel %vm366_vm1, %v424_v62, 0.0 }
  0xe0   : > { %v425_v2 = vsub.f32 %v626_v61, %v423_v63  ;;  %v427_v3 = vsel %vm366_vm1, %v423_v63, 0.0 }
  0xe1   : > { %v441_v4 = vsel %vm366_vm1, %v426_v0, 0.0  ;;  %v429_v5 = vadd.f32 %v428_v1, %v427_v3 }
  0xe2   : > { %v440_v6 = vsel %vm366_vm1, %v425_v2, 0.0 }
  0xe3   : > { %v430_v7 = vrot.slane %v429_v5, 4  ;;  %v442_v8 = vadd.f32 %v441_v4, %v440_v6 }
  0xe5   : > { %v431_v9 = vadd.f32 %v430_v7, %v429_v5  ;;  %v443_v10 = vrot.slane %v442_v8, 4 }
  0xe7   : > { %v432_v11 = vrot.slane %v431_v9, 2  ;;  %v444_v12 = vadd.f32 %v443_v10, %v442_v8 }
  0xe9   : > { %v433_v13 = vadd.f32 %v432_v11, %v431_v9  ;;  %v445_v17 = vrot.slane %v444_v12, 2 }
  0xeb   : > { %v434_v19 = vrot.slane %v433_v13, 1  ;;  %v446_v20 = vadd.f32 %v445_v17, %v444_v12 }
  0xed   : > { %v435_v21 = vadd.f32 %v434_v19, %v433_v13  ;;  %v447_v22 = vrot.slane %v446_v20, 1 }
  0xef   : > { %627 = vlog2.f32 %v435_v21  ;;  %v448_v24 = vadd.f32 %v447_v22, %v446_v20 }
  0xf1   : > { %629 = vlog2.f32 %v448_v24 }
  0xf9   : > { %v628_v26 = vpop.eup %627 }
  0xfa   : > { %v437_v28 = vmul.f32 0.6931472, %v628_v26 }
  0xfb   : > { %v630_v29 = vpop.eup %629 }
  0xfc   : > { %v450_v30 = vmul.f32 0.6931472, %v630_v29  ;;  %v438_v31 = vmul.f32 %v437_v28, %v723_v14  ;;  %v439_v33 = vmul.f32 %v437_v28, %v725_v15  ;;  %v482_v15 = vand.u32 127, %v481_v45 }
  0xfe   : > { %v451_v32 = vmul.f32 %v450_v30, %v727_v16  ;;  %v452_v34 = vmul.f32 %v450_v30, %v729_v18  ;;  %v484_v18 = vstv %s590_s9 }
  0xff   : > { %v485_v49 = vadd.s32 %v484_v18, %v482_v15 }
 0x100   : > { %v453_v36 = vadd.f32 %v451_v32, %v438_v31  ;;  %v454_v37 = vadd.f32 %v452_v34, %v439_v33 }
 0x101   : > { %vm486_vm2 = vcmp.lt.s32.totalorder %v485_v49, 8 }
 0x102   : > { %v455_v38 = vsub.f32 %v417_v57, %v453_v36  ;;  %v456_v40 = vsub.f32 %v418_v56, %v454_v37 }
 0x104   : > { %v469_v42 = vmul.f32 %v467_v39, %v455_v38  ;;  %v470_v43 = vmul.f32 %v468_v41, %v456_v40 }
 0x106   : > { %v471_v44 = vsel %vm366_vm1, %v469_v42, 0.0  ;;  %v472_v14 = vsel %vm366_vm1, %v470_v43, 0.0 }
 0x107   : > { %v473_v16 = vadd.f32 %v472_v14, %v471_v44 }
 0x109   : > { %v474_v46 = vrot.slane %v473_v16, 4 }
 0x10b   : > { %v475_v47 = vadd.f32 %v474_v46, %v473_v16 }
 0x10d   : > { %v476_v48 = vrot.slane %v475_v47, 2 }
 0x10f   : > { %v477_v50 = vadd.f32 %v476_v48, %v475_v47 }
 0x111   : > { %v478_v51 = vrot.slane %v477_v50, 1 }
 0x113   : > { %v479_v52 = vadd.f32 %v478_v51, %v477_v50 }
 0x115   : > { %v488_v54 = vsel %vm486_vm2, %v479_v52, 0.0 }
 0x116   : > { %v489_v55 = vadd.f32 %v488_v54, %v487_v53 }
 0x118   : > { %491 = vst.msk [vmem:[#allocation2] sm:$0x1] %vm266_vm0, %v489_v55 }
 0x11f   : > { %v495_v56 = vld [vmem:[#allocation2] sm:$0x1] }
 0x120   : > { %v496_v57 = vsel %vm266_vm0, %v495_v56, 0.0 }
 0x121   : > { %497 = vadd.xlane.f32.xlu0 %v496_v57 }
 0x1ae   : > { %v498_v58 = vpop.xlane.xlu0 %497 }
 0x1af   : > { %v499_v59 = vrot.slane %v498_v58, 4 }
 0x1b1   : > { %v500_v60 = vadd.f32 %v499_v59, %v498_v58 }
 0x1b3   : > { %v501_v61 = vrot.slane %v500_v60, 2 }
 0x1b5   : > { %v502_v62 = vadd.f32 %v501_v61, %v500_v60 }
 0x1b7   : > { %v503_v63 = vrot.slane %v502_v62, 1 }
 0x1b9   : > { %v504_v0 = vadd.f32 %v503_v63, %v502_v62 }
 0x1bb   : > { %593 = vpush %v504_v0 }
 0x1ec   : > { %s594_s10 = spop %593 }
 0x1ed   : > { %s506_s14 = smul.f32 -0.125, %s594_s10 }
 0x1ef   : > { %v507_v1 = vstv %s506_s14 }
 0x1f0   : > { %509 = vst.msk [vmem:[%s261_s13] sm:$0x1] %vm508_vm3, %v507_v1 }
 0x1f1 PF: > { %s14_s17 = sadd.s32 1, %s653_s17   ;;  %s777_s15 = smov %s649_s16 }
 0x1f2   : > { %p11_p6 = scmp.ge.s32.totalorder %s14_s17, 4   ;;  %s778_s16 = smov %s780_s18 }
 0x1f4   :  { %13 = sbr.rel (!%p11_p6) target bundleno = 2 (0x2), region = 77 }

</bundles_post_ra>
